<compile_context>
chip_gen: v5e
topology: v5e:2x2
jax: 0.10.0
libtpu: 0.0.40
codegen_flags: <defaults>
</compile_context>

<pallas_src>
import jax
import jax.numpy as jnp
import numpy as np
from jax.experimental import pallas as pl
from jax.experimental.pallas import tpu as pltpu


def _transition_kernel(a_ref, z_ref, v_ref, m_ref, wu_ref, n_ref, h_ref, o_ref):
    # a_ref:  SMEM (1,1) precomputed decay A = exp(-exp(decay_param))
    # z_ref:  (dz, tile)  v_ref:  (du, tile)
    # m_ref:  (N, dz)     wu_ref: (N, du)    n_ref: (dz, N)   h_ref: (N, 1)
    # o_ref:  (dz, tile)
    A = a_ref[0, 0]
    z = z_ref[...]
    # X^T = m @ z + Wu @ v   -> (N, tile)
    x = jnp.dot(m_ref[...], z, preferred_element_type=jnp.float32)
    x = x + jnp.dot(wu_ref[...], v_ref[...], preferred_element_type=jnp.float32)
    # R = relu(X - h)  (h broadcast over lanes)
    r = jnp.maximum(x - h_ref[...], 0.0)
    # z_out = A*z + n @ R   -> (dz, tile)
    o_ref[...] = (A * z + jnp.dot(n_ref[...], r, preferred_element_type=jnp.float32)
                  ).astype(o_ref.dtype)


def transition_forward(z, v, m, n, Wu, h, decay_param, *, tn=32768):
    """
    Args:
        z: (B, dz, T, K) latents
        v: (B, du, T, K) filtered inputs
        m: (N, dz), n: (dz, N), Wu: (N, du), h: (N,),
        decay_param: raw decay parameter, log(-log(decay)) (any size-1 shape)
        tn: target lane-tile size in columns (rounded down to a multiple of 128).
            Per-generation sweet spots: ~32-48k (v5e), ~48-64k (v6e), ~100-150k (v7x).
    Returns:
        z_out: (B, dz, T, K)
    """
    B, dz, T, K = z.shape
    N, du = Wu.shape
    TK = T * K

    # Feature-major flattened views (contiguous layout: free reshapes, no copies).
    z3 = z.reshape(B, dz, TK)
    v3 = v.reshape(B, du, TK)

    # Lane tile: full TK axis if it fits in one tile (full-extent blocks bypass the
    # 128-lane divisibility rule), otherwise a large 128-multiple tile. Ragged
    # trailing blocks are handled by Pallas edge masking — no padding, no slicing.
    target = max(128, tn - (tn % 128))
    tile = TK if TK <= target else target

    # Megacore guard: never collapse the grid to a single step (v7x has 2 TCs).
    if B * pl.cdiv(TK, tile) < 2 and TK > 128:
        tile = max(128, (((TK + 1) // 2) + 127) // 128 * 128)

    grid = (B, pl.cdiv(TK, tile))

    # Precompute decay on the host (removes per-step EUP transcendentals).
    decay_flat = jnp.asarray(decay_param, jnp.float32).reshape(-1)[0]
    A = jnp.exp(-jnp.exp(decay_flat)).reshape(1, 1)
    h2 = h.reshape(N, 1).astype(jnp.float32)

    out3 = pl.pallas_call(
        _transition_kernel,
        out_shape=jax.ShapeDtypeStruct((B, dz, TK), z.dtype),
        grid_spec=pltpu.PrefetchScalarGridSpec(
            num_scalar_prefetch=0,
            grid=grid,
            in_specs=[
                pl.BlockSpec((1, 1), lambda b, j: (0, 0), memory_space=pltpu.SMEM),
                pl.BlockSpec((pl.Squeezed(), dz, tile), lambda b, j: (b, 0, j)),
                pl.BlockSpec((pl.Squeezed(), du, tile), lambda b, j: (b, 0, j)),
                pl.BlockSpec((N, dz), lambda b, j: (0, 0)),   # weights stay VMEM-resident
                pl.BlockSpec((N, du), lambda b, j: (0, 0)),
                pl.BlockSpec((dz, N), lambda b, j: (0, 0)),
                pl.BlockSpec((N, 1), lambda b, j: (0, 0)),
            ],
            out_specs=pl.BlockSpec((pl.Squeezed(), dz, tile), lambda b, j: (b, 0, j)),
        ),
        compiler_params=pltpu.CompilerParams(
            dimension_semantics=("parallel", "parallel")),
    )(A, z3, v3, m, Wu, n, h2)

    return out3.reshape(B, dz, T, K)


def reference_forward(z, v, m, n, Wu, h, decay_param):
    A = jnp.exp(-jnp.exp(jnp.asarray(decay_param, jnp.float32).reshape(-1)[0]))
    X = jnp.einsum('Nz,BzTK->BNTK', m, z) + jnp.einsum('Nu,BuTK->BNTK', Wu, v)
    R = jnp.maximum(X - h[None, :, None, None], 0.0)             # relu nonlinearity
    return A * z + jnp.einsum('zN,BNTK->BzTK', n, R)


if __name__ == "__main__":
    # small shapes consistent with the module's forward
    B, dz, du, N = 2, 4, 3, 32

    key = jax.random.PRNGKey(0)
    k1, k2, k3, k4, k5 = jax.random.split(key, 5)

    # deterministic parameter init (mirrors __init__ shapes; uniform weight dist)
    bound = 1.0 / np.sqrt(N)
    m = jax.random.uniform(k1, (N, dz), jnp.float32, -bound, bound)   # self.m: (hidden, dz)
    n = jax.random.uniform(k2, (dz, N), jnp.float32, -bound, bound)   # self.n: (dz, hidden)
    Wu = jax.random.uniform(k3, (N, du), jnp.float32, -bound, bound)  # self.Wu
    h = jnp.zeros((N,), jnp.float32)                                  # relu branch -> zeros
    decay_param = jnp.log(-jnp.log(jnp.float32(0.7)))                 # log(-log(decay))

    # --- case 1: tiny T*K, single full-extent lane block per batch ---
    T, K = 8, 2
    z = jax.random.normal(k4, (B, dz, T, K), jnp.float32)
    v = jax.random.normal(k5, (B, du, T, K), jnp.float32)
    out = jax.block_until_ready(transition_forward(z, v, m, n, Wu, h, decay_param))
    ref = reference_forward(z, v, m, n, Wu, h, decay_param)
    np.testing.assert_allclose(np.asarray(out), np.asarray(ref), rtol=1e-5, atol=1e-5)

    # --- case 2: ragged T*K exercising the masked trailing-block path (no padding) ---
    T2, K2 = 20, 8                                                    # TK = 160, tile = 128
    kz, kv = jax.random.split(k4)
    z2 = jax.random.normal(kz, (B, dz, T2, K2), jnp.float32)
    v2 = jax.random.normal(kv, (B, du, T2, K2), jnp.float32)
    out2 = jax.block_until_ready(
        transition_forward(z2, v2, m, n, Wu, h, decay_param, tn=128))
    ref2 = reference_forward(z2, v2, m, n, Wu, h, decay_param)
    np.testing.assert_allclose(np.asarray(out2), np.asarray(ref2), rtol=1e-5, atol=1e-5)

    # --- case 3: B=1 exercising the megacore guard (lane axis split into >=2 steps) ---
    T3, K3 = 256, 2                                                   # TK = 512 -> tile 256, 2 steps
    kz3, kv3 = jax.random.split(k5)
    z3 = jax.random.normal(kz3, (1, dz, T3, K3), jnp.float32)
    v3 = jax.random.normal(kv3, (1, du, T3, K3), jnp.float32)
    out3 = jax.block_until_ready(transition_forward(z3, v3, m, n, Wu, h, decay_param))
    ref3 = reference_forward(z3, v3, m, n, Wu, h, decay_param)
    np.testing.assert_allclose(np.asarray(out3), np.asarray(ref3), rtol=1e-5, atol=1e-5)

    print("KERNEL_OK")
</pallas_src>

<mosaic_0001>
module attributes {stable_mosaic.version = 11 : i64} {
  func.func @_transition_kernel(%arg0: i32, %arg1: i32, %arg2: memref<1x1xf32, #tpu.memory_space<smem>>, %arg3: memref<1x4x16xf32, #tpu.memory_space<vmem>>, %arg4: memref<1x3x16xf32, #tpu.memory_space<vmem>>, %arg5: memref<32x4xf32, #tpu.memory_space<vmem>>, %arg6: memref<32x3xf32, #tpu.memory_space<vmem>>, %arg7: memref<4x32xf32, #tpu.memory_space<vmem>>, %arg8: memref<32x1xf32, #tpu.memory_space<vmem>>, %arg9: memref<1x4x16xf32, #tpu.memory_space<vmem>>) attributes {dimension_semantics = [#tpu.dimension_semantics<parallel>, #tpu.dimension_semantics<parallel>], iteration_bounds = array<i64: 2, 1>, scalar_prefetch = 0 : i64, scratch_operands = 0 : i64, tpu.core_type = #tpu.core_type<tc>, window_params = [{transform_indices = @transform_0, window_bounds = array<i64: 1, 1>}, {transform_indices = @transform_1, window_bounds = array<i64: 1, 4, 16>}, {transform_indices = @transform_2, window_bounds = array<i64: 1, 3, 16>}, {pipeline_mode = #tpu.pipeline_mode<synchronous>, transform_indices = @transform_3, window_bounds = array<i64: 32, 4>}, {pipeline_mode = #tpu.pipeline_mode<synchronous>, transform_indices = @transform_4, window_bounds = array<i64: 32, 3>}, {pipeline_mode = #tpu.pipeline_mode<synchronous>, transform_indices = @transform_5, window_bounds = array<i64: 4, 32>}, {pipeline_mode = #tpu.pipeline_mode<synchronous>, transform_indices = @transform_6, window_bounds = array<i64: 32, 1>}, {transform_indices = @transform_7, window_bounds = array<i64: 1, 4, 16>}]} {
    %c0 = arith.constant 0 : index
    %c0_0 = arith.constant 0 : index
    %0 = memref.load %arg2[%c0, %c0_0] : memref<1x1xf32, #tpu.memory_space<smem>>
    %c0_1 = arith.constant 0 : index
    %c0_2 = arith.constant 0 : index
    %c0_3 = arith.constant 0 : index
    %1 = vector.load %arg3[%c0_1, %c0_2, %c0_3] : memref<1x4x16xf32, #tpu.memory_space<vmem>>, vector<1x4x16xf32>
    %2 = vector.shape_cast %1 : vector<1x4x16xf32> to vector<4x16xf32>
    %c0_4 = arith.constant 0 : index
    %c0_5 = arith.constant 0 : index
    %3 = vector.load %arg5[%c0_4, %c0_5] : memref<32x4xf32, #tpu.memory_space<vmem>>, vector<32x4xf32>
    %cst = arith.constant dense<0.000000e+00> : vector<32x16xf32>
    %4 = tpu.matmul %3, %2, %cst {dimension_numbers = #tpu.dot_dimension_numbers<[1], [0], [0], [1], [0, 0, 1, 1], [], []>} : vector<32x4xf32>, vector<4x16xf32>, vector<32x16xf32> -> vector<32x16xf32>
    %c0_6 = arith.constant 0 : index
    %c0_7 = arith.constant 0 : index
    %5 = vector.load %arg6[%c0_6, %c0_7] : memref<32x3xf32, #tpu.memory_space<vmem>>, vector<32x3xf32>
    %c0_8 = arith.constant 0 : index
    %c0_9 = arith.constant 0 : index
    %c0_10 = arith.constant 0 : index
    %6 = vector.load %arg4[%c0_8, %c0_9, %c0_10] : memref<1x3x16xf32, #tpu.memory_space<vmem>>, vector<1x3x16xf32>
    %7 = vector.shape_cast %6 : vector<1x3x16xf32> to vector<3x16xf32>
    %cst_11 = arith.constant dense<0.000000e+00> : vector<32x16xf32>
    %8 = tpu.matmul %5, %7, %cst_11 {dimension_numbers = #tpu.dot_dimension_numbers<[1], [0], [0], [1], [0, 0, 1, 1], [], []>} : vector<32x3xf32>, vector<3x16xf32>, vector<32x16xf32> -> vector<32x16xf32>
    %9 = arith.addf %4, %8 : vector<32x16xf32>
    %c0_12 = arith.constant 0 : index
    %c0_13 = arith.constant 0 : index
    %10 = vector.load %arg8[%c0_12, %c0_13] : memref<32x1xf32, #tpu.memory_space<vmem>>, vector<32x1xf32>
    %11 = vector.broadcast %10 : vector<32x1xf32> to vector<32x16xf32>
    %12 = arith.subf %9, %11 : vector<32x16xf32>
    %cst_14 = arith.constant 0.000000e+00 : f32
    %13 = vector.broadcast %cst_14 : f32 to vector<32x16xf32>
    %14 = arith.maximumf %12, %13 : vector<32x16xf32>
    %15 = vector.broadcast %0 : f32 to vector<4x16xf32>
    %16 = arith.mulf %15, %2 : vector<4x16xf32>
    %c0_15 = arith.constant 0 : index
    %c0_16 = arith.constant 0 : index
    %17 = vector.load %arg7[%c0_15, %c0_16] : memref<4x32xf32, #tpu.memory_space<vmem>>, vector<4x32xf32>
    %cst_17 = arith.constant dense<0.000000e+00> : vector<4x16xf32>
    %18 = tpu.matmul %17, %14, %cst_17 {dimension_numbers = #tpu.dot_dimension_numbers<[1], [0], [0], [1], [0, 0, 1, 1], [], []>} : vector<4x32xf32>, vector<32x16xf32>, vector<4x16xf32> -> vector<4x16xf32>
    %19 = arith.addf %16, %18 : vector<4x16xf32>
    %c0_18 = arith.constant 0 : index
    %c0_19 = arith.constant 0 : index
    %c0_20 = arith.constant 0 : index
    %20 = vector.load %arg9[%c0_18, %c0_19, %c0_20] : memref<1x4x16xf32, #tpu.memory_space<vmem>>, vector<1x4x16xf32>
    %21 = vector.shape_cast %20 : vector<1x4x16xf32> to vector<4x16xf32>
    %22 = vector.shape_cast %19 : vector<4x16xf32> to vector<1x4x16xf32>
    tpu.vector_store %arg9[%c0_18, %c0_19, %c0_20], %22 {strides = array<i32>} : memref<1x4x16xf32, #tpu.memory_space<vmem>>, vector<1x4x16xf32>,
    return
  }
  func.func @transform_0(%arg0: i32, %arg1: i32) -> (i32, i32) {
    %c0_i32 = arith.constant 0 : i32
    %c0_i32_0 = arith.constant 0 : i32
    %c0_i32_1 = arith.constant 0 : i32
    return %c0_i32, %c0_i32_0 : i32, i32
  }
  func.func @transform_1(%arg0: i32, %arg1: i32) -> (i32, i32, i32) {
    %c0_i32 = arith.constant 0 : i32
    %c0_i32_0 = arith.constant 0 : i32
    return %arg0, %c0_i32, %arg1 : i32, i32, i32
  }
  func.func @transform_2(%arg0: i32, %arg1: i32) -> (i32, i32, i32) {
    %c0_i32 = arith.constant 0 : i32
    %c0_i32_0 = arith.constant 0 : i32
    return %arg0, %c0_i32, %arg1 : i32, i32, i32
  }
  func.func @transform_3(%arg0: i32, %arg1: i32) -> (i32, i32) {
    %c0_i32 = arith.constant 0 : i32
    %c0_i32_0 = arith.constant 0 : i32
    %c0_i32_1 = arith.constant 0 : i32
    return %c0_i32, %c0_i32_0 : i32, i32
  }
  func.func @transform_4(%arg0: i32, %arg1: i32) -> (i32, i32) {
    %c0_i32 = arith.constant 0 : i32
    %c0_i32_0 = arith.constant 0 : i32
    %c0_i32_1 = arith.constant 0 : i32
    return %c0_i32, %c0_i32_0 : i32, i32
  }
  func.func @transform_5(%arg0: i32, %arg1: i32) -> (i32, i32) {
    %c0_i32 = arith.constant 0 : i32
    %c0_i32_0 = arith.constant 0 : i32
    %c0_i32_1 = arith.constant 0 : i32
    return %c0_i32, %c0_i32_0 : i32, i32
  }
  func.func @transform_6(%arg0: i32, %arg1: i32) -> (i32, i32) {
    %c0_i32 = arith.constant 0 : i32
    %c0_i32_0 = arith.constant 0 : i32
    %c0_i32_1 = arith.constant 0 : i32
    return %c0_i32, %c0_i32_0 : i32, i32
  }
  func.func @transform_7(%arg0: i32, %arg1: i32) -> (i32, i32, i32) {
    %c0_i32 = arith.constant 0 : i32
    %c0_i32_0 = arith.constant 0 : i32
    return %arg0, %c0_i32, %arg1 : i32, i32, i32
  }
}

</mosaic_0001>

<bundles_post_ra>
// kernel: tpu_custom_call.1
= control target key start
LH: loop header
LB: loop body
LE: loop exit
PB: predicated region body
PF: predicated region fallthrough
CT: control target
= control target key end

     0   :  { %s954_s0 = inlined_call_operand.<no memory space> [shape: f32[1,1], index: 0, kind: input, shape index: {}]   ;;  %s955_s1 = inlined_call_operand.vmem [shape: f32[2,4,16], index: 1, kind: input, shape index: {}]   ;;  %s956_s2 = inlined_call_operand.vmem [shape: f32[2,3,16], index: 2, kind: input, shape index: {}]   ;;  %s957_s3 = inlined_call_operand.vmem [shape: f32[32,4], index: 3, kind: input, shape index: {}]   ;;  %s958_s4 = inlined_call_operand.vmem [shape: f32[32,3], index: 4, kind: input, shape index: {}]   ;;  %s959_s5 = inlined_call_operand.vmem [shape: f32[4,32], index: 5, kind: input, shape index: {}]   ;;  %s960_s6 = inlined_call_operand.vmem [shape: f32[32,1], index: 6, kind: input, shape index: {}]   ;;  %s961_s7 = inlined_call_operand.hbm [shape: f32[2,4,16], index: 7, kind: output, shape index: {}]  }
   0x1   :  { %12 = sst [smem:[#allocation2]] %s954_s0 }
   0x2   :  { %13 = vsyncpa [#allocation4], 0 }
   0x3   :  { %15 = vsyncpa [#allocation4 + $0x1], 0  ;;  %s803_s26 = smov 0   ;;  %s805_s27 = smov 0  }
   0x4   :  { %s807_s28 = smov 0   ;;  %s809_s29 = smov 0  }
   0x5   :  { %s811_s30 = smov 0   ;;  %s813_s8 = smov 0  }
   0x6 LB: > { %s596_s0 = sadd.s32 4294967295, %s757_s8   ;;  %s597_s9 = sadd.s32 4294967294, %s757_s8   ;;  %s757_s8 = sphi %s813_s8, %s21_s8   ;;  %s753_s30 = sphi %s811_s30, %s968_s30   ;;  %s749_s29 = sphi %s809_s29, %s967_s29   ;;  %s745_s28 = sphi %s807_s28, %s966_s28   ;;  %s741_s27 = sphi %s805_s27, %s965_s27   ;;  %s737_s26 = sphi %s803_s26, %s964_s26  }
   0x7   : > { %s33_s10 = sadd.s32 1, %s753_s30  ;;  %s203_s11 = sadd.s32 1, %s745_s28 }
   0x8   : > { %p35_p0 = scmp.ge.s32.totalorder %s33_s10, 2  ;;  %p213_p1 = scmp.ne.s32.totalorder %s745_s28, %s741_s27 }
   0x9   : > { %p214_p2 = scmp.eq.s32.totalorder %s596_s0, 1  ;;  %p219_p3 = scmp.ne.s32.totalorder %s741_s27, %s737_s26 }
   0xa   : > { %s970_s10 = smov (%p35_p0, %s33_s10), 0  ;;  %p220_p5 = scmp.eq.s32.totalorder %s597_s9, 1 }
   0xb   : > { %p843_p4 = por %p214_p2, %p213_p1  ;;  %s198_s13 = ssub.s32 %s753_s30, %s970_s10 }
   0xc   : > { %p600_p6 = scmp.ge.s32.totalorder %s757_s8, 1  ;;  %p201_p7 = scmp.eq.s32.totalorder %s198_s13, 0 }
   0xd   : > { %p850_p8 = por %p220_p5, %p219_p3  ;;  %p273_p9 = scmp.lt.s32.totalorder %s757_s8, 3 }
   0xe   : > { %s856_s15 = scalar_select %p201_p7, %s745_s28, %s203_s11  }
   0xf   : > { %p274_p10 = pnand %p600_p6, %p273_p9 }
  0x10   : > { %p314_p11 = scmp.lt.s32.totalorder (!%p274_p10), %s749_s29, 1  ;;  %s328_s22 = sld [smem:[#allocation2]] (!%p274_p10) }
  0x11   : > { %277 = sbr.rel (%p274_p10) target bundleno = 326 (0x146), region = 48  ;;  %s311_s23 = sand.u32 (!%p274_p10), 1, %s741_s27  }
  0x12   : > { %s616_s25 = sshll.u32 (!%p274_p10), %s749_s29, 2 }
  0x13   : > { %s505_s11 = scalar_lea.hbm (!%p274_p10), %s961_s7, %s616_s25 }
  0x14   : > { %s509_s18 = sshll.u32 (!%p274_p10), %s505_s11, 4  ;;  %s510_s18 = int_to_ptr.hbm [resolvable:$true] %s509_s18 }
  0x15   : > { %s693_s19 = sshra.s32 (!%p274_p10), %s510_s18, 4  ;;  %s694_s19 = int_to_ptr.hbm [resolvable:$true] %s693_s19 }
  0x16   : > { %s315_s16 = scalar_select %p314_p11, %s749_s29, 1  ;;  %v759_v0 = vmov 0   ;;  %v434_v1 = vld [vmem:[%s960_s6 + $0x18] sm:$0xff]  ;;  %v432_v2 = vld [vmem:[%s960_s6 + $0x8] sm:$0xff]  ;;  %vm352_vm0 = vcmask 1042432   ;;  %vm398_vm1 = vcmask 1043456   ;;  %v463_v40 = vstv %s328_s22 }
  0x17   : > { %678 = vset.pattern.permute.xlu1 %v759_v0  ;;  %677 = vset.pattern.permute.xlu0 %v759_v0  ;;  %v335_v3 = vld [vmem:[%s958_s4 + $0x8] sm:$0xff]  ;;  %vm339_vm2 = vcmask 23552   ;;  %vm385_vm3 = vcmask 31744   ;;  %v334_v7 = vld [vmem:[%s958_s4] sm:$0xff]  ;;  %v433_v8 = vld [vmem:[%s960_s6 + $0x10] sm:$0xff]  ;;  %vm466_vm4 = vcmask 261120   ;;  %p700_p1 = scmp.lt.s32.totalorder %s694_s19, %s961_s7 }
  0x18   : > { %452 = vperm.xlu0 %677, %v434_v1   ;;  %442 = vperm.xlu1 %678, %v432_v2   ;;  %s602_s21 = sshll.u32 %s315_s16, 2  ;;  %v331_v4 = vld [vmem:[%s957_s3 + $0x8] sm:$0xff]  ;;  %v431_v9 = vld [vmem:[%s960_s6] sm:$0xff]  ;;  %v336_v10 = vld [vmem:[%s958_s4 + $0x10] sm:$0xff]  ;;  %vm491_vm5 = vcmask 125952   ;;  %s494_s16 = scalar_lea.sflag [#allocation4], %s311_s23 }
  0x19   : > { %s327_s24 = scalar_lea.vmem %s956_s2, %s602_s21  ;;  %s320_s13 = scalar_lea.vmem %s955_s1, %s602_s21  ;;  %v332_v11 = vld [vmem:[%s957_s3 + $0x10] sm:$0xff]  ;;  %v330_v12 = vld [vmem:[%s957_s3] sm:$0xff]  ;;  %v337_v13 = vld [vmem:[%s958_s4 + $0x18] sm:$0xff] }
  0x1a   : > { %v338_v5 = vld [vmem:[%s327_s24] sm:$0x7]  ;;  %v333_v14 = vld [vmem:[%s957_s3 + $0x18] sm:$0xff]  ;;  %s601_s24 = sshll.u32 %s311_s23, 2  ;;  %s695_s29 = scalar_lea.hbm %s694_s19, 4 }
  0x1b   : > { %v329_v6 = vld [vmem:[%s320_s13] sm:$0xf]  ;;  %619 = vmatpush.msk.msra.mxu3 %vm352_vm0, %v338_v5  ;;  %604 = vmatpush.msk.msra.mxu0 %vm352_vm0, %v338_v5  ;;  %s313_s13 = scalar_lea.vmem [#allocation3], %s601_s24  ;;  %p696_p12 = scmp.ne.s32.totalorder %s694_s19, %s695_s29 }
  0x1c   : > { %620 = vmatpush.msk.msra.mxu1 %vm398_vm1, %v329_v6  ;;  %606 = vmatmul.msk.f32.vlgmr.msra.gmra.mxu3 %vm339_vm2, %v335_v3  ;;  %v465_v39 = vld [vmem:[%s959_s5] sm:$0xf]  ;;  %v464_v41 = vmul.f32 %v463_v40, %v329_v6  ;;  %s507_s17 = sshll.u32 %s313_s13, 4  ;;  %s699_s22 = scalar_lea.hbm %s961_s7, 8  ;;  %s508_s17 = int_to_ptr.vmem [resolvable:$true] %s507_s17 }
  0x1d   : > { %611 = vmatmul.msk.f32.vlgmr.msra.gmra.mxu1 %vm385_vm3, %v331_v4  ;;  %605 = vmatmul.msk.f32.vlgmr.msra.gmra.mxu0 %vm339_vm2, %v334_v7  ;;  %p697_p13 = pnand %p696_p12, %p843_p4  ;;  %p701_p2 = scmp.lt.s32.totalorder %s699_s22, %s695_s29 }
  0x1e   : > { %609 = vmatpush.msk.msrb.mxu0 %vm398_vm1, %v329_v6 }
  0x1f   : > { %p698_p0 = pneg %p697_p13  ;;  %p702_p3 = por %p701_p2, %p700_p1 }
  0x20   : > { %447 = vperm.xlu0 %677, %v433_v8   ;;  %437 = vperm.xlu1 %678, %v431_v9  }
  0x21   : > { %p703_p5 = pnand %p702_p3, %p698_p0 }
  0x24   : > { %607 = vmatmul.msk.f32.gmra.mxu3 %vm339_vm2, %v336_v10 }
  0x25   : > { %612 = vmatmul.msk.f32.gmra.mxu1 %vm385_vm3, %v332_v11  ;;  %610 = vmatmul.msk.f32.vlgmr.msrb.gmra.mxu0 %vm385_vm3, %v330_v12 }
  0x2c   : > { %608 = vmatmul.msk.f32.gmra.mxu3 %vm339_vm2, %v337_v13 }
  0x2d   : > { %613 = vmatmul.msk.f32.gmra.mxu1 %vm385_vm3, %v333_v14 }
  0x8a   : > { %v453_v18 = vpop.permute.xlu0 %452  ;;  %v443_v21 = vpop.permute.xlu1 %442 }
  0x92   : > { %v448_v24 = vpop.permute.xlu0 %447  ;;  %v438_v32 = vpop.permute.xlu1 %437 }
  0x9a   : > { %v422_v15 = vpop.f32.mrf.mxu1  ;;  %v373_v19 = vpop.f32.mrf.mxu0 }
  0x9f   : > { %v376_v16 = vpop.f32.mrf.mxu3 }
  0xa0   : > { %v423_v27 = vadd.f32 %v422_v15, %v376_v16 }
  0xa2   : > { %v425_v17 = vpop.f32.mrf.mxu1  ;;  %v419_v25 = vpop.f32.mrf.mxu0  ;;  %v456_v33 = vsub.f32 %v423_v27, %v443_v21 }
  0xa3   : > { %v420_v30 = vadd.f32 %v419_v25, %v373_v19 }
  0xa4   : > { %v460_v37 = vmax.f32 %v456_v33, 0.0 }
  0xa5   : > { %v455_v36 = vsub.f32 %v420_v30, %v438_v32 }
  0xa7   : > { %v379_v20 = vpop.f32.mrf.mxu3  ;;  %v459_v38 = vmax.f32 %v455_v36, 0.0 }
  0xa8   : > { %v426_v23 = vadd.f32 %v425_v17, %v379_v20 }
  0xaa   : > { %v428_v22 = vpop.f32.mrf.mxu1  ;;  %v457_v29 = vsub.f32 %v426_v23, %v448_v24 }
  0xac   : > { %v461_v35 = vmax.f32 %v457_v29, 0.0 }
  0xaf   : > { %v382_v26 = vpop.f32.mrf.mxu3 }
  0xb0   : > { %v429_v28 = vadd.f32 %v428_v22, %v382_v26 }
  0xb2   : > { %v458_v31 = vsub.f32 %v429_v28, %v453_v18 }
  0xb4   : > { %v462_v34 = vmax.f32 %v458_v31, 0.0 }
  0xb6   : > { %482 = vmatpush.msra.mxu2 %v462_v34 }
  0xb8   : > { %483 = vmatpush.msra.mxu2 %v461_v35 }
  0xba   : > { %484 = vmatpush.msra.mxu2 %v460_v37 }
  0xbc   : > { %485 = vmatpush.msra.mxu2 %v459_v38 }
  0xbd   : > { %614 = vmatmul.msk.f32.vlgmr.msra.gmra.mxu2 %vm466_vm4, %v465_v39 }
 0x140   : > { %v487_v42 = vpop.f32.mrf.mxu2 }
 0x141   : > { %v490_v43 = vadd.f32 %v487_v42, %v464_v41 }
 0x143   : > { %492 = vst.msk [vmem:[%s313_s13] sm:$0xf] %vm491_vm5, %v490_v43 }
 0x144   : > { %706 = shalt.err (!%p703_p5)
}
 0x145   : > { %621 = dma.vmem_to_hbm [thread:$0]  (%p843_p4), %s508_s17, 64, %s510_s18, %s494_s16  }
 0x146 PF: > { %p627_p6 = scmp.ge.s32.totalorder %s757_s8, 2  ;;  %s521_s23 = sand.u32 1, %s737_s26  }
 0x147   : > { %s522_s0 = scalar_lea.sflag [#allocation4], %s521_s23 }
 0x148   : > { %p624_p7 = pnand %p627_p6, %p850_p8 }
 0x14a   : > { %p625_p9 = pneg %p624_p7 }
 0x14c   : > { %732 = dma.done.wait (%p625_p9), %s522_s0, 64  }
 0x14d   : > { %734 = vsyncadd (%p625_p9), %s522_s0, 4294967232  ;;  %s21_s8 = sadd.s32 1, %s757_s8   ;;  %s964_s26 = smov %s741_s27 }
 0x14e   : > { %p18_p10 = scmp.ge.s32.totalorder %s21_s8, 4   ;;  %s965_s27 = smov %s745_s28 }
 0x14f   : > { %s966_s28 = smov %s856_s15  ;;  %s967_s29 = smov %s753_s30 }
 0x150   : > { %s968_s30 = smov %s970_s10  ;;  %20 = sbr.rel (!%p18_p10) target bundleno = 6 (0x6), region = 86 }
 0x155   :  { %528 = vsyncpa [#allocation4], 1 }
 0x156   :  { %530 = vsyncpa [#allocation4 + $0x1], 1 }

</bundles_post_ra>
